<compile_context>
chip_gen: v7x
topology: tpu7x:2x2x1
jax: 0.10.0
libtpu: 0.0.40
codegen_flags: <defaults>
</compile_context>

<pallas_src>
import jax
import jax.numpy as jnp
from jax.experimental import pallas as pl
from jax.experimental.pallas import tpu as pltpu


def _round_up(x, m):
    return (x + m - 1) // m * m


def _vmem_bytes(C, OC, tile, act_bytes, out_bytes):
    """Rough VMEM footprint: double-buffered activations/output + weights + f32 acc."""
    acts = (2 * C * tile + 8 * C) * act_bytes + OC * tile * out_bytes   # xe + xo + halo + out
    weights = 5 * OC * C * act_bytes + OC * 4                           # fused taps + bias
    return 2 * acts + 2 * weights + OC * tile * 4


def _vmem_budget_and_cap():
    """Generation-aware VMEM budget (v7x: 64 MiB physical vs 128 MiB on v5e/v6e)."""
    try:
        phys = pltpu.get_tpu_info().vmem_capacity_bytes
        return int(phys * 0.55), int(phys * 0.70)
    except Exception:
        return 36 << 20, 48 << 20   # conservative fallback, safe even on v7x


def _downsample_kernel(xe_ref, xo_ref, halo_ref, w_ref, b_ref, o_ref):
    # One (batch, length-tile) grid step.
    #   xe_ref  : (1, C, T)     even samples of the pad=2 padded input for this tile
    #   xo_ref  : (1, C, T)     odd samples
    #   halo_ref: (1, 1, C, 8)  next tile's first stream columns: [:,0:2] even, [:,2:3] odd
    #   w_ref   : (5, OC, C)    fused 5-tap weights (tap-major)
    #   b_ref   : (1, OC)       fused bias (f32)
    #   o_ref   : (1, OC, T)
    oc, t_len = o_ref.shape[1], o_ref.shape[2]
    halo = halo_ref[0, 0]                                       # (C, 8)
    xe = jnp.concatenate([xe_ref[0], halo[:, 0:2]], axis=1)     # (C, T+2)
    xo = jnp.concatenate([xo_ref[0], halo[:, 2:3]], axis=1)     # (C, T+1)

    acc = jnp.zeros((oc, t_len), jnp.float32)
    # output position o, tap t reads padded index 2*o + t:
    #   t even -> even stream, lane offset t//2 ; t odd -> odd stream, lane offset t//2
    # TODO(synk): for very small C, stack the 5 taps into one K=5*C matmul for better MXU
    # fill; at Deepurify's real channel counts (>=256) the 5-dot accumulation is fine.
    for t in range(5):
        off = t // 2
        src = xe if (t % 2 == 0) else xo
        seg = src[:, off:off + t_len]                           # (C, T), contiguous lanes
        acc = acc + jnp.dot(w_ref[t], seg,                      # (OC, C) @ (C, T) on MXU
                            preferred_element_type=jnp.float32)
    acc = acc + b_ref[...].reshape(oc, 1)
    o_ref[...] = acc[None].astype(o_ref.dtype)


def downsample_pallas(x, w5, b5, w3, b3, *, compute_dtype=None, lo_tile=None):
    """y = Conv1d(k=5,s=2,p=2)(x) + Conv1d(k=3,s=2,p=1)(x); x is (B, C, L)."""
    B, C, L = x.shape
    OC = w5.shape[0]
    Lo = (L - 1) // 2 + 1                       # output length of both stride-2 convs
    cdt = jnp.dtype(compute_dtype) if compute_dtype is not None else jnp.dtype(x.dtype)
    act_bytes = cdt.itemsize
    out_bytes = jnp.dtype(x.dtype).itemsize

    budget, vmem_cap = _vmem_budget_and_cap()
    if lo_tile is None:
        lo_tile = min(512, _round_up(Lo, 128))
        while lo_tile > 128 and _vmem_bytes(C, OC, lo_tile, act_bytes, out_bytes) > budget:
            lo_tile -= 128
    n_tiles = pl.cdiv(Lo, lo_tile)
    lo_pad = n_tiles * lo_tile                  # lane-dense, exactly divisible by the tile

    # ---- fuse the two convs: the k=3/pad=1 conv aligns with taps 1..3 of the k=5 conv ----
    w_eff = w5.astype(jnp.float32).at[:, :, 1:4].add(w3.astype(jnp.float32))  # (OC, C, 5)
    w_eff = jnp.transpose(w_eff, (2, 0, 1)).astype(cdt)                       # (5, OC, C)
    b_eff = (b5.astype(jnp.float32) + b3.astype(jnp.float32)).reshape(1, OC)

    # ---- even/odd streams of the pad=2 padded input (deinterleaved once) ----
    #   even_stream[m] = padded[2m]   = [0, x0, x2, ...]
    #   odd_stream[m]  = padded[2m+1] = [0, x1, x3, ...]
    ext = lo_pad + 2
    xe_ext = jnp.pad(x[:, :, 0::2], ((0, 0), (0, 0), (1, ext - 1 - (L + 1) // 2))).astype(cdt)
    xo_ext = jnp.pad(x[:, :, 1::2], ((0, 0), (0, 0), (1, ext - 1 - L // 2))).astype(cdt)
    # TODO(synk): the pad + strided slices above cost one extra HBM round-trip of x; fusing
    # them into the pallas_call (allow_input_fusion) or deinterleaving in-kernel would
    # remove it.

    # Per-tile halo sidecar: the first 2 even / 1 odd stream columns of the NEXT tile.
    starts = jnp.arange(1, n_tiles + 1, dtype=jnp.int32) * lo_tile
    hidx = (starts[:, None] + jnp.arange(2, dtype=jnp.int32)[None, :]).reshape(-1)
    he = jnp.take(xe_ext, hidx, axis=-1).reshape(B, C, n_tiles, 2)
    ho = jnp.take(xo_ext, hidx, axis=-1).reshape(B, C, n_tiles, 2)
    halo = jnp.concatenate([he, ho, jnp.zeros((B, C, n_tiles, 4), cdt)], axis=-1)
    halo = jnp.transpose(halo, (0, 2, 1, 3))                    # (B, n_tiles, C, 8)

    xe = xe_ext[:, :, :lo_pad]                                  # (B, C, lo_pad)
    xo = xo_ext[:, :, :lo_pad]

    cost = pl.CostEstimate(
        flops=2 * B * OC * 5 * C * lo_pad,
        transcendentals=0,
        bytes_accessed=int((xe.size + xo.size + halo.size + w_eff.size) * act_bytes
                           + b_eff.size * 4 + B * OC * Lo * out_bytes))
    vmem_limit = int(min(vmem_cap,
                         max(32 << 20,
                             2 * _vmem_bytes(C, OC, lo_tile, act_bytes, out_bytes))))

    out = pl.pallas_call(
        _downsample_kernel,
        out_shape=jax.ShapeDtypeStruct((B, OC, lo_pad), x.dtype),
        grid_spec=pltpu.PrefetchScalarGridSpec(
            num_scalar_prefetch=0,
            grid=(B, n_tiles),
            in_specs=[
                pl.BlockSpec((1, C, lo_tile), lambda b, t: (b, 0, t)),
                pl.BlockSpec((1, C, lo_tile), lambda b, t: (b, 0, t)),
                pl.BlockSpec((1, 1, C, 8), lambda b, t: (b, t, 0, 0)),
                pl.BlockSpec((5, OC, C), lambda b, t: (0, 0, 0)),
                pl.BlockSpec((1, OC), lambda b, t: (0, 0)),
            ],
            out_specs=pl.BlockSpec((1, OC, lo_tile), lambda b, t: (b, 0, t)),
        ),
        compiler_params=pltpu.CompilerParams(
            dimension_semantics=("parallel", "parallel"),
            vmem_limit_bytes=vmem_limit),
        cost_estimate=cost,
    )(xe, xo, halo, w_eff, b_eff)

    return out if lo_pad == Lo else out[:, :, :Lo]


def downsample_ref(x, w5, b5, w3, b3):
    dn = ('NCH', 'OIH', 'NCH')
    p = jax.lax.Precision.HIGHEST
    y5 = jax.lax.conv_general_dilated(x, w5, window_strides=(2,), padding=[(2, 2)],
                                      dimension_numbers=dn, precision=p)
    y3 = jax.lax.conv_general_dilated(x, w3, window_strides=(2,), padding=[(1, 1)],
                                      dimension_numbers=dn, precision=p)
    return y5 + b5[None, :, None] + y3 + b3[None, :, None]


if __name__ == "__main__":
    key = jax.random.PRNGKey(0)

    def init_params(k, C, OC):
        k2, k3, k4, k5 = jax.random.split(k, 4)
        bound5 = 1.0 / (C * 5) ** 0.5
        bound3 = 1.0 / (C * 3) ** 0.5
        w5 = jax.random.uniform(k2, (OC, C, 5), jnp.float32, -bound5, bound5)
        b5 = jax.random.uniform(k3, (OC,), jnp.float32, -bound5, bound5)
        w3 = jax.random.uniform(k4, (OC, C, 3), jnp.float32, -bound3, bound3)
        b3 = jax.random.uniform(k5, (OC,), jnp.float32, -bound3, bound3)
        return w5, b5, w3, b3

    def check(B, C, OC, L, *, compute_dtype=None, lo_tile=None, atol=1e-4, rtol=1e-4):
        kx, kp = jax.random.split(jax.random.fold_in(key, C * 100000 + L))
        x = jax.random.normal(kx, (B, C, L), jnp.float32)
        w5, b5, w3, b3 = init_params(kp, C, OC)
        out = jax.block_until_ready(
            downsample_pallas(x, w5, b5, w3, b3,
                              compute_dtype=compute_dtype, lo_tile=lo_tile))
        ref = downsample_ref(x, w5, b5, w3, b3)
        assert out.shape == ref.shape == (B, OC, (L - 1) // 2 + 1), (out.shape, ref.shape)
        err = float(jnp.max(jnp.abs(out - ref)))
        assert jnp.allclose(out, ref, atol=atol, rtol=rtol), (B, C, OC, L, err)

    # small single-tile case (f32)
    check(2, 4, 8, 16)
    # multi-tile + halo, odd L, not a multiple of the tile (f32)
    check(2, 8, 16, 601, lo_tile=128)
    # larger channel count, multi-tile (f32)
    check(1, 160, 32, 390, lo_tile=128)
    # bf16 compute path (f32 accumulation), looser tolerance
    check(2, 4, 8, 601, compute_dtype=jnp.bfloat16, lo_tile=128, atol=1e-1, rtol=1e-1)

    print("KERNEL_OK")
</pallas_src>

<mosaic_0001>
module attributes {stable_mosaic.version = 11 : i64} {
  func.func @_downsample_kernel(%arg0: i32, %arg1: i32, %arg2: memref<1x4x128xf32, #tpu.memory_space<vmem>>, %arg3: memref<1x4x128xf32, #tpu.memory_space<vmem>>, %arg4: memref<1x1x4x8xf32, #tpu.memory_space<vmem>>, %arg5: memref<5x8x4xf32, #tpu.memory_space<vmem>>, %arg6: memref<1x8xf32, #tpu.memory_space<vmem>>, %arg7: memref<1x8x128xf32, #tpu.memory_space<vmem>>) attributes {dimension_semantics = [#tpu.dimension_semantics<parallel>, #tpu.dimension_semantics<parallel>], iteration_bounds = array<i64: 2, 1>, scalar_prefetch = 0 : i64, scratch_operands = 0 : i64, tpu.core_type = #tpu.core_type<tc>, window_params = [{transform_indices = @transform_0, window_bounds = array<i64: 1, 4, 128>}, {transform_indices = @transform_1, window_bounds = array<i64: 1, 4, 128>}, {transform_indices = @transform_2, window_bounds = array<i64: 1, 1, 4, 8>}, {pipeline_mode = #tpu.pipeline_mode<synchronous>, transform_indices = @transform_3, window_bounds = array<i64: 5, 8, 4>}, {pipeline_mode = #tpu.pipeline_mode<synchronous>, transform_indices = @transform_4, window_bounds = array<i64: 1, 8>}, {transform_indices = @transform_5, window_bounds = array<i64: 1, 8, 128>}]} {
    %c0 = arith.constant 0 : index
    %c0_0 = arith.constant 0 : index
    %c0_1 = arith.constant 0 : index
    %c0_2 = arith.constant 0 : index
    %0 = vector.load %arg4[%c0, %c0_0, %c0_1, %c0_2] : memref<1x1x4x8xf32, #tpu.memory_space<vmem>>, vector<1x1x4x8xf32>
    %1 = vector.shape_cast %0 : vector<1x1x4x8xf32> to vector<4x8xf32>
    %c0_3 = arith.constant 0 : index
    %c0_4 = arith.constant 0 : index
    %c0_5 = arith.constant 0 : index
    %2 = vector.load %arg2[%c0_3, %c0_4, %c0_5] : memref<1x4x128xf32, #tpu.memory_space<vmem>>, vector<1x4x128xf32>
    %3 = vector.shape_cast %2 : vector<1x4x128xf32> to vector<4x128xf32>
    %4 = vector.extract_strided_slice %1 {offsets = [0, 0], sizes = [4, 2], strides = [1, 1]} : vector<4x8xf32> to vector<4x2xf32>
    %5 = tpu.concatenate %3, %4 in 1 : vector<4x128xf32>, vector<4x2xf32> -> vector<4x130xf32>
    %c0_6 = arith.constant 0 : index
    %c0_7 = arith.constant 0 : index
    %c0_8 = arith.constant 0 : index
    %6 = vector.load %arg3[%c0_6, %c0_7, %c0_8] : memref<1x4x128xf32, #tpu.memory_space<vmem>>, vector<1x4x128xf32>
    %7 = vector.shape_cast %6 : vector<1x4x128xf32> to vector<4x128xf32>
    %8 = vector.extract_strided_slice %1 {offsets = [0, 2], sizes = [4, 1], strides = [1, 1]} : vector<4x8xf32> to vector<4x1xf32>
    %9 = tpu.concatenate %7, %8 in 1 : vector<4x128xf32>, vector<4x1xf32> -> vector<4x129xf32>
    %cst = arith.constant 0.000000e+00 : f32
    %10 = vector.broadcast %cst : f32 to vector<8x128xf32>
    %11 = vector.extract_strided_slice %5 {offsets = [0, 0], sizes = [4, 128], strides = [1, 1]} : vector<4x130xf32> to vector<4x128xf32>
    %c0_9 = arith.constant 0 : index
    %c0_10 = arith.constant 0 : index
    %c0_11 = arith.constant 0 : index
    %12 = vector.load %arg5[%c0_9, %c0_10, %c0_11] : memref<5x8x4xf32, #tpu.memory_space<vmem>>, vector<1x8x4xf32>
    %13 = vector.shape_cast %12 : vector<1x8x4xf32> to vector<8x4xf32>
    %cst_12 = arith.constant dense<0.000000e+00> : vector<8x128xf32>
    %14 = tpu.matmul %13, %11, %cst_12 {dimension_numbers = #tpu.dot_dimension_numbers<[1], [0], [0], [1], [0, 0, 1, 1], [], []>} : vector<8x4xf32>, vector<4x128xf32>, vector<8x128xf32> -> vector<8x128xf32>
    %15 = arith.addf %10, %14 : vector<8x128xf32>
    %16 = vector.extract_strided_slice %9 {offsets = [0, 0], sizes = [4, 128], strides = [1, 1]} : vector<4x129xf32> to vector<4x128xf32>
    %c1 = arith.constant 1 : index
    %c0_13 = arith.constant 0 : index
    %c0_14 = arith.constant 0 : index
    %17 = vector.load %arg5[%c1, %c0_13, %c0_14] : memref<5x8x4xf32, #tpu.memory_space<vmem>>, vector<1x8x4xf32>
    %18 = vector.shape_cast %17 : vector<1x8x4xf32> to vector<8x4xf32>
    %cst_15 = arith.constant dense<0.000000e+00> : vector<8x128xf32>
    %19 = tpu.matmul %18, %16, %cst_15 {dimension_numbers = #tpu.dot_dimension_numbers<[1], [0], [0], [1], [0, 0, 1, 1], [], []>} : vector<8x4xf32>, vector<4x128xf32>, vector<8x128xf32> -> vector<8x128xf32>
    %20 = arith.addf %15, %19 : vector<8x128xf32>
    %21 = vector.extract_strided_slice %5 {offsets = [0, 1], sizes = [4, 128], strides = [1, 1]} : vector<4x130xf32> to vector<4x128xf32>
    %c2 = arith.constant 2 : index
    %c0_16 = arith.constant 0 : index
    %c0_17 = arith.constant 0 : index
    %22 = vector.load %arg5[%c2, %c0_16, %c0_17] : memref<5x8x4xf32, #tpu.memory_space<vmem>>, vector<1x8x4xf32>
    %23 = vector.shape_cast %22 : vector<1x8x4xf32> to vector<8x4xf32>
    %cst_18 = arith.constant dense<0.000000e+00> : vector<8x128xf32>
    %24 = tpu.matmul %23, %21, %cst_18 {dimension_numbers = #tpu.dot_dimension_numbers<[1], [0], [0], [1], [0, 0, 1, 1], [], []>} : vector<8x4xf32>, vector<4x128xf32>, vector<8x128xf32> -> vector<8x128xf32>
    %25 = arith.addf %20, %24 : vector<8x128xf32>
    %26 = vector.extract_strided_slice %9 {offsets = [0, 1], sizes = [4, 128], strides = [1, 1]} : vector<4x129xf32> to vector<4x128xf32>
    %c3 = arith.constant 3 : index
    %c0_19 = arith.constant 0 : index
    %c0_20 = arith.constant 0 : index
    %27 = vector.load %arg5[%c3, %c0_19, %c0_20] : memref<5x8x4xf32, #tpu.memory_space<vmem>>, vector<1x8x4xf32>
    %28 = vector.shape_cast %27 : vector<1x8x4xf32> to vector<8x4xf32>
    %cst_21 = arith.constant dense<0.000000e+00> : vector<8x128xf32>
    %29 = tpu.matmul %28, %26, %cst_21 {dimension_numbers = #tpu.dot_dimension_numbers<[1], [0], [0], [1], [0, 0, 1, 1], [], []>} : vector<8x4xf32>, vector<4x128xf32>, vector<8x128xf32> -> vector<8x128xf32>
    %30 = arith.addf %25, %29 : vector<8x128xf32>
    %31 = vector.extract_strided_slice %5 {offsets = [0, 2], sizes = [4, 128], strides = [1, 1]} : vector<4x130xf32> to vector<4x128xf32>
    %c4 = arith.constant 4 : index
    %c0_22 = arith.constant 0 : index
    %c0_23 = arith.constant 0 : index
    %32 = vector.load %arg5[%c4, %c0_22, %c0_23] : memref<5x8x4xf32, #tpu.memory_space<vmem>>, vector<1x8x4xf32>
    %33 = vector.shape_cast %32 : vector<1x8x4xf32> to vector<8x4xf32>
    %cst_24 = arith.constant dense<0.000000e+00> : vector<8x128xf32>
    %34 = tpu.matmul %33, %31, %cst_24 {dimension_numbers = #tpu.dot_dimension_numbers<[1], [0], [0], [1], [0, 0, 1, 1], [], []>} : vector<8x4xf32>, vector<4x128xf32>, vector<8x128xf32> -> vector<8x128xf32>
    %35 = arith.addf %30, %34 : vector<8x128xf32>
    %c0_25 = arith.constant 0 : index
    %c0_26 = arith.constant 0 : index
    %36 = vector.load %arg6[%c0_25, %c0_26] : memref<1x8xf32, #tpu.memory_space<vmem>>, vector<1x8xf32>
    %37 = vector.shape_cast %36 : vector<1x8xf32> to vector<8x1xf32>
    %38 = vector.broadcast %37 : vector<8x1xf32> to vector<8x128xf32>
    %39 = arith.addf %35, %38 : vector<8x128xf32>
    %40 = vector.shape_cast %39 : vector<8x128xf32> to vector<1x8x128xf32>
    %c0_27 = arith.constant 0 : index
    %c0_28 = arith.constant 0 : index
    %c0_29 = arith.constant 0 : index
    %41 = vector.load %arg7[%c0_27, %c0_28, %c0_29] : memref<1x8x128xf32, #tpu.memory_space<vmem>>, vector<1x8x128xf32>
    tpu.vector_store %arg7[%c0_27, %c0_28, %c0_29], %40 {strides = array<i32>} : memref<1x8x128xf32, #tpu.memory_space<vmem>>, vector<1x8x128xf32>,
    return
  }
  func.func @transform_0(%arg0: i32, %arg1: i32) -> (i32, i32, i32) {
    %c0_i32 = arith.constant 0 : i32
    %c0_i32_0 = arith.constant 0 : i32
    return %arg0, %c0_i32, %arg1 : i32, i32, i32
  }
  func.func @transform_1(%arg0: i32, %arg1: i32) -> (i32, i32, i32) {
    %c0_i32 = arith.constant 0 : i32
    %c0_i32_0 = arith.constant 0 : i32
    return %arg0, %c0_i32, %arg1 : i32, i32, i32
  }
  func.func @transform_2(%arg0: i32, %arg1: i32) -> (i32, i32, i32, i32) {
    %c0_i32 = arith.constant 0 : i32
    %c0_i32_0 = arith.constant 0 : i32
    %c0_i32_1 = arith.constant 0 : i32
    return %arg0, %arg1, %c0_i32, %c0_i32_0 : i32, i32, i32, i32
  }
  func.func @transform_3(%arg0: i32, %arg1: i32) -> (i32, i32, i32) {
    %c0_i32 = arith.constant 0 : i32
    %c0_i32_0 = arith.constant 0 : i32
    %c0_i32_1 = arith.constant 0 : i32
    %c0_i32_2 = arith.constant 0 : i32
    return %c0_i32, %c0_i32_0, %c0_i32_1 : i32, i32, i32
  }
  func.func @transform_4(%arg0: i32, %arg1: i32) -> (i32, i32) {
    %c0_i32 = arith.constant 0 : i32
    %c0_i32_0 = arith.constant 0 : i32
    %c0_i32_1 = arith.constant 0 : i32
    return %c0_i32, %c0_i32_0 : i32, i32
  }
  func.func @transform_5(%arg0: i32, %arg1: i32) -> (i32, i32, i32) {
    %c0_i32 = arith.constant 0 : i32
    %c0_i32_0 = arith.constant 0 : i32
    return %arg0, %c0_i32, %arg1 : i32, i32, i32
  }
}

</mosaic_0001>

<bundles_post_ra>
// kernel: tpu_custom_call.1
= control target key start
LH: loop header
LB: loop body
LE: loop exit
PB: predicated region body
PF: predicated region fallthrough
CT: control target
= control target key end

     0   :  { %10 = vsyncpa [#allocation3], 0  ;;  %s1229_s0 = inlined_call_operand.vmem [shape: f32[2,4,128], index: 0, kind: input, shape index: {}]   ;;  %s1230_s1 = inlined_call_operand.vmem [shape: f32[2,4,128], index: 1, kind: input, shape index: {}]   ;;  %s1231_s2 = inlined_call_operand.vmem [shape: f32[2,1,4,8], index: 2, kind: input, shape index: {}]   ;;  %s1232_s3 = inlined_call_operand.vmem [shape: f32[5,8,4], index: 3, kind: input, shape index: {}]   ;;  %s1233_s4 = inlined_call_operand.vmem [shape: f32[1,8], index: 4, kind: input, shape index: {}]   ;;  %s1234_s5 = inlined_call_operand.hbm [shape: f32[2,8,128], index: 5, kind: output, shape index: {}]  }
   0x1   :  { %12 = vsyncpa [#allocation3 + $0x1], 0  ;;  %s1076_s18 = smov 0   ;;  %s1078_s19 = smov 0  }
   0x2   :  { %s1080_s20 = smov 0   ;;  %s1082_s21 = smov 0  }
   0x3   :  { %s1084_s22 = smov 0   ;;  %s1086_s23 = smov 0  }
   0x4 LB: > { %s839_s24 = sadd.s32 4294967295, %s1039_s23   ;;  %s840_s25 = sadd.s32 4294967294, %s1039_s23   ;;  %s1039_s23 = sphi %s1086_s23, %s18_s23   ;;  %s1035_s22 = sphi %s1084_s22, %s1241_s22   ;;  %s1031_s21 = sphi %s1082_s21, %s1240_s21   ;;  %s1027_s20 = sphi %s1080_s20, %s1239_s20   ;;  %s1023_s19 = sphi %s1078_s19, %s1238_s19   ;;  %s1019_s18 = sphi %s1076_s18, %s1237_s18  }
   0x5   : > { %s30_s26 = sadd.s32 1, %s1035_s22  ;;  %s165_s27 = sadd.s32 1, %s1027_s20 }
   0x6   : > { %p32_p0 = scmp.ge.s32.totalorder %s30_s26, 2  ;;  %p175_p1 = scmp.ne.s32.totalorder %s1027_s20, %s1023_s19 }
   0x7   : > { %p176_p2 = scmp.eq.s32.totalorder %s839_s24, 1  ;;  %p181_p3 = scmp.ne.s32.totalorder %s1023_s19, %s1019_s18 }
   0x8   : > { %s1243_s26 = smov (%p32_p0, %s30_s26), 0  ;;  %p182_p5 = scmp.eq.s32.totalorder %s840_s25, 1 }
   0x9   : > { %p1116_p4 = por %p176_p2, %p175_p1  ;;  %s160_s29 = ssub.s32 %s1035_s22, %s1243_s26 }
   0xa   : > { %p843_p6 = scmp.ge.s32.totalorder %s1039_s23, 1  ;;  %p163_p7 = scmp.eq.s32.totalorder %s160_s29, 0 }
   0xb   : > { %p1123_p8 = por %p182_p5, %p181_p3  ;;  %p236_p9 = scmp.lt.s32.totalorder %s1039_s23, 3 }
   0xc   : > { %s1129_s6 = scalar_select %p163_p7, %s1027_s20, %s165_s27  }
   0xd   : > { %p237_p10 = pnand %p843_p6, %p236_p9 }
   0xe   : > { %p280_p11 = scmp.lt.s32.totalorder (!%p237_p10), %s1031_s21, 1  ;;  %v1041_v0 = vmov (!%p237_p10), 0.0   ;;  %vm1042_vm0 = vmmov (!%p237_p10), 0   ;;  %vm314_vm1 = vcmask (!%p237_p10), 1043456   ;;  %v848_v2 = vld [vmem:[%s1232_s3 + $0x8] sm:$0xff] (!%p237_p10)  ;;  %vm310_vm2 = vcmask (!%p237_p10), 31744  }
   0xf   : > { %240 = sbr.rel (%p237_p10) target bundleno = 491 (0x1eb), region = 40  ;;  %877 = vmatprep.subr.mxu0 (!%p237_p10), %v1041_v0  ;;  %879 = vmatprep.mubr.msk.f32.mxu0 (!%p237_p10), %vm1042_vm0, %v1041_v0  ;;  %s1043_s27 = smov (!%p237_p10), 127   ;;  %v307_v5 = vld [vmem:[%s1232_s3] sm:$0xff] (!%p237_p10)  ;;  %vm470_vm3 = vcmask (!%p237_p10), 1039360   ;;  %v853_v11 = vld [vmem:[%s1232_s3 + $0x10] sm:$0xff] (!%p237_p10)  ;;  %vm635_vm4 = vcmask (!%p237_p10), 1031168  }
  0x10   : > { %882 = vmatprep.subr.mxu1 (!%p237_p10), %v1041_v0  ;;  %884 = vmatprep.mubr.msk.f32.mxu1 (!%p237_p10), %vm1042_vm0, %v1041_v0  ;;  %s1044_s29 = smov (!%p237_p10), 126   ;;  %v862_v8 = vld [vmem:[%s1233_s4] ss:$0 sm:$0xff] (!%p237_p10)  ;;  %v856_v19 = vld [vmem:[%s1232_s3 + $0x18] sm:$0xff] (!%p237_p10)  ;;  %s864_s25 = sshll.u32 (!%p237_p10), %s1031_s21, 7 }
  0x11   : > { %v859_v14 = vld [vmem:[%s1232_s3 + $0x20] sm:$0xff] (!%p237_p10)  ;;  %s1182_s9 = scalar_lea.hbm (!%p237_p10), %s1234_s5, %s864_s25 }
  0x16   : > { %s281_s7 = scalar_select %p280_p11, %s1031_s21, 1 }
  0x17   : > { %s1045_s21 = smov [#allocation2]  }
  0x18   : > { %s845_s8 = sshll.u32 %s281_s7, 2  ;;  %s965_s12 = sshll.u32 %s1045_s21, 4  ;;  %s966_s12 = int_to_ptr.vmem [resolvable:$false] %s965_s12 }
  0x19   : > { %s300_s11 = scalar_lea.vmem %s1231_s2, %s845_s8  ;;  %s293_s14 = scalar_lea.vmem %s1230_s1, %s845_s8 }
  0x1a   : > { %v301_v1 = vld [vmem:[%s300_s11] sm:$0xf]  ;;  %s286_s17 = scalar_lea.vmem %s1229_s0, %s845_s8  ;;  %s967_s13 = scalar_lea.vmem %s966_s12, 256 }
  0x1b   : > { %468 = vrot.lane.b32.xlu1 %v301_v1, %s1043_s27  ;;  %305 = vrot.lane.b32.xlu0 %v301_v1, %s1044_s29  ;;  %v303_v3 = vld [vmem:[%s293_s14] sm:$0xf] }
  0x1c   : > { %v302_v4 = vld [vmem:[%s286_s17] sm:$0xf]  ;;  %878 = vmatpush3.msk.msra.mxu0 %vm314_vm1, %v303_v3  ;;  %s277_s17 = sand.u32 1, %s1023_s19  }
  0x1d   : > { %883 = vmatpush3.msk.msra.mxu1 %vm314_vm1, %v302_v4  ;;  %880 = vmatmul.mubr.msk.f32.vlgmr.msra.gmra.mrb[0].mxu0 %vm310_vm2, %v848_v2  ;;  %s844_s24 = sshll.u32 %s277_s17, 3  ;;  %s724_s10 = scalar_lea.sflag [#allocation3], %s277_s17 }
  0x1e   : > { %887 = vmatprep.subr.mxu0 %v1041_v0  ;;  %889 = vmatprep.mubr.msk.f32.mxu0 %vm1042_vm0, %v1041_v0 }
  0x1f   : > { %892 = vmatprep.subr.mxu1 %v1041_v0  ;;  %550 = vrot.lane.b32.xlu1 %v303_v3, %s1043_s27 }
  0x20   : > { %466 = vrot.lane.b32.xlu0 %v302_v4, %s1043_s27  ;;  %885 = vmatmul.mubr.msk.f32.vlgmr.msra.gmra.mrb[0].mxu1 %vm310_vm2, %v307_v5 }
  0x21   : > { %894 = vmatprep.mubr.msk.f32.mxu1 %vm1042_vm0, %v1041_v0 }
  0x23   : > { %633 = vrot.lane.b32.xlu1 %v302_v4, %s1044_s29 }
  0x8d   : > { %v469_v6 = vpop.permute.xlu1 %468  ;;  %v306_v7 = vpop.permute.xlu0 %305 }
  0x8e   : > { %552 = vrot.lane.b32.xlu0 %v306_v7, %s1043_s27  ;;  %s279_s27 = scalar_lea.vmem [#allocation2], %s844_s24 }
  0x8f   : > { %s738_s29 = sshll.u32 %s279_s27, 4  ;;  %s1184_s29 = int_to_ptr.vmem [resolvable:$true] %s738_s29 }
  0x90   : > { %s961_s11 = scalar_lea.vmem %s1184_s29, 128  ;;  %p968_p1 = scmp.lt.s32.totalorder %s1184_s29, %s966_s12 }
  0x91   : > { %v551_v9 = vpop.permute.xlu1 %550  ;;  %p962_p12 = scmp.ne.s32.totalorder %s1184_s29, %s961_s11  ;;  %p969_p2 = scmp.lt.s32.totalorder %s967_s13, %s961_s11 }
  0x92   : > { %v467_v10 = vpop.permute.xlu0 %466  ;;  %719 = vbcast.lane.b32.xlu0 %v862_v8, 256 }
  0x93   : > { %v471_v12 = vsel %vm470_vm3, %v467_v10, %v469_v6  ;;  %p963_p13 = pnand %p962_p12, %p1116_p4  ;;  %p970_p3 = por %p969_p2, %p968_p1 }
  0x94   : > { %888 = vmatpush3.msk.msra.mxu0 %vm314_vm1, %v471_v12 }
  0x95   : > { %897 = vmatprep.subr.mxu0 %v1041_v0  ;;  %890 = vmatmul.mubr.msk.f32.vlgmr.msra.gmra.mrb[2].mxu0 %vm310_vm2, %v853_v11  ;;  %v634_v13 = vpop.permute.xlu1 %633  ;;  %p964_p0 = pneg %p963_p13 }
  0x96   : > { %899 = vmatprep.mubr.msk.f32.mxu0 %vm1042_vm0, %v1041_v0  ;;  %v636_v15 = vsel %vm635_vm4, %v634_v13, %v306_v7 }
  0x97   : > { %898 = vmatpush3.msk.msra.mxu0 %vm314_vm1, %v636_v15  ;;  %p971_p5 = pnand %p970_p3, %p964_p0 }
  0x99   : > { %900 = vmatmul.mubr.msk.f32.vlgmr.msra.gmra.mrb[4].mxu0 %vm310_vm2, %v859_v14 }
  0xf0   : > { %v384_v16 = vpop.f32.mrb[0].mxu0 }
  0xf1   : > { %v881_v17 = vpop.f32.mrb[1].mxu0 }
  0xf3   : > { %v460_v21 = vpop.f32.mrb[0].mxu1 }
  0xf4   : > { %v461_v22 = vadd.f32 %v460_v21, %v384_v16  ;;  %v886_v23 = vpop.f32.mrb[1].mxu1 }
 0x100   : > { %v553_v18 = vpop.permute.xlu0 %552 }
 0x101   : > { %v554_v20 = vsel %vm470_vm3, %v551_v9, %v553_v18 }
 0x102   : > { %893 = vmatpush3.msk.msra.mxu1 %vm314_vm1, %v554_v20 }
 0x103   : > { %895 = vmatmul.mubr.msk.f32.vlgmr.msra.gmra.mrb[2].mxu1 %vm310_vm2, %v856_v19 }
 0x104   : > { %v720_v32 = vpop.permute.xlu0 %719 }
 0x168   : > { %v543_v24 = vpop.f32.mrb[2].mxu0 }
 0x169   : > { %v547_v25 = vadd.f32 %v543_v24, %v461_v22  ;;  %v891_v26 = vpop.f32.mrb[3].mxu0 }
 0x16c   : > { %v708_v27 = vpop.f32.mrb[4].mxu0 }
 0x16d   : > { %v901_v28 = vpop.f32.mrb[5].mxu0 }
 0x1d6   : > { %v626_v29 = vpop.f32.mrb[2].mxu1 }
 0x1d7   : > { %v630_v30 = vadd.f32 %v626_v29, %v547_v25  ;;  %v896_v31 = vpop.f32.mrb[3].mxu1 }
 0x1d9   : > { %v712_v33 = vadd.f32 %v708_v27, %v630_v30 }
 0x1db   : > { %v721_v34 = vadd.f32 %v720_v32, %v712_v33 }
 0x1dd   : > { %722 = vst [vmem:[%s279_s27] sm:$0xff] %v721_v34 }
 0x1de   : > { %974 = shalt.err (!%p971_p5)
}
 0x1df   : > { %s975_s14 = scalar_lea.hbm %s1182_s9, 128  ;;  %s979_s17 = scalar_lea.hbm %s1234_s5, 256 }
 0x1e0   : > { %p976_p6 = scmp.ne.s32.totalorder %s1182_s9, %s975_s14  ;;  %p980_p10 = scmp.lt.u32.totalorder %s1182_s9, %s1234_s5 }
 0x1e1   : > { %p981_p11 = scmp.lt.u32.totalorder %s979_s17, %s975_s14  ;;  %p983_p13 = scmp.lt.u32.totalorder %s975_s14, %s1182_s9 }
 0x1e2   : > { %p977_p7 = pnand %p976_p6, %p1116_p4 }
 0x1e3   : > { %p982_p12 = por %p981_p11, %p980_p10 }
 0x1e4   : > { %p978_p9 = pneg %p977_p7 }
 0x1e5   : > { %p984_p0 = por %p983_p13, %p982_p12 }
 0x1e7   : > { %p985_p1 = pnand %p984_p0, %p978_p9 }
 0x1e9   : > { %988 = shalt.err (!%p985_p1)
}
 0x1ea   : > { %902 = dma.vmem_to_hbm [thread:$0]  (%p1116_p4), %s1184_s29, 128, %s1182_s9, %s724_s10  }
 0x1eb PF: > { %p908_p2 = scmp.ge.s32.totalorder %s1039_s23, 2  ;;  %s750_s27 = sand.u32 1, %s1019_s18  }
 0x1ec   : > { %s751_s7 = scalar_lea.sflag [#allocation3], %s750_s27 }
 0x1ed   : > { %p905_p3 = pnand %p908_p2, %p1123_p8 }
 0x1ef   : > { %1014 = dma.done.wait (!%p905_p3), %s751_s7, 128  }
 0x1f0   : > { %1016 = vsyncadd (!%p905_p3), %s751_s7, 4294967168  ;;  %s18_s23 = sadd.s32 1, %s1039_s23   ;;  %s1237_s18 = smov %s1023_s19 }
 0x1f1   : > { %p15_p5 = scmp.ge.s32.totalorder %s18_s23, 4   ;;  %s1238_s19 = smov %s1027_s20 }
 0x1f2   : > { %s1239_s20 = smov %s1129_s6  ;;  %s1240_s21 = smov %s1035_s22 }
 0x1f3   : > { %s1241_s22 = smov %s1243_s26  ;;  %17 = sbr.rel (!%p15_p5) target bundleno = 4 (0x4), region = 85 }
 0x1fa   :  { %756 = vsyncpa [#allocation3], 1 }
 0x1fb   :  { %758 = vsyncpa [#allocation3 + $0x1], 1 }

</bundles_post_ra>
